<compile_context>
chip_gen: v7x
topology: tpu7x:2x2x1
jax: 0.10.0
libtpu: 0.0.40
codegen_flags: <defaults>
</compile_context>

<pallas_src>
import functools

import jax
import jax.numpy as jnp
from jax import lax
from jax.experimental import pallas as pl
from jax.experimental.pallas import tpu as pltpu


def _component_codes(mode, immovable):
    """Static component codes for the quadrants of the virtual joined matrices.

    Codes: 0 -> Dr1, 1 -> Dr2, 2 -> elementwise min/max(Dr1, Dr2).
    Returns ((birth_BL, birth_BR), (death_BL, death_BR)), where BL is the
    bottom-left (== transposed top-right) block and BR the bottom-right block
    of the virtual [[0, BL.T], [BL, BR]] layout.  Births are the even index
    rows, deaths the odd ones (matching the reference's [::2] / [1::2]).
    """
    if mode == 'minimum':
        dx = (0, 2)                       # DX   = [[0, Dr1.T], [Dr1, min]]
        if immovable == 2:
            dx2 = (0, 0)                  # DX_2 = [[0, Dr1.T], [Dr1, Dr1]]
        elif immovable == 1:
            dx2 = (0, 1)                  # DX_2 = [[0, Dr1.T], [Dr1, Dr2]]
        else:
            dx2 = dx                      # DX_2 = DX
        return dx, dx2                    # births from DX, deaths from DX_2
    else:
        dx = (2, 1)                       # DX   = [[0, max.T], [max, Dr2]]
        if immovable == 2:
            dx2 = (0, 1)                  # [[0, Dr1.T], [Dr1, Dr2]]
        elif immovable == 1:
            dx2 = (1, 1)                  # [[0, Dr2.T], [Dr2, Dr2]]
        else:
            dx2 = dx
        return dx2, dx                    # births from DX_2, deaths from DX


def _decompose(r, c, n):
    """Quadrant decomposition of joined-matrix indices into (n, n) indices."""
    r_lo = r < n
    c_lo = c < n
    in_tl = jnp.logical_and(r_lo, c_lo)       # top-left zero block
    offdiag = jnp.logical_xor(r_lo, c_lo)     # TR / BL -> bottom-left matrix
    # Effective (row, col) into the (n, n) base matrices:
    #   BL: (r-n, c)   TR: (c-n, r) (= BL.T)   BR: (r-n, c-n)   TL: masked
    rr = jnp.where(r_lo, c - n, r - n)        # TL -> negative -> masked / zero
    cc = jnp.where(r_lo, r, jnp.where(c_lo, c, c - n))
    return in_tl, offdiag, rr, cc


# ----------------------------------------------------------------------------
# Path 1 (small n): full-matrix one-hot MXU gather, grid=(dim,).
# ----------------------------------------------------------------------------
def _rtd_onehot_kernel(dr1_ref, dr2_ref, idx_ref, dgm_ref, *, mode, immovable,
                       n, card):
    g = 2 * card
    idx = idx_ref[...]                        # (g, 2) int32, interleaved b/d
    r = idx[:, 0:1]                           # (g, 1)
    c = idx[:, 1:2]
    _, offdiag, rr, cc = _decompose(r, c, n)

    lane = lax.broadcasted_iota(jnp.int32, (g, n), 1)
    row_onehot = (lane == rr).astype(jnp.float32)     # (g, n); zero for TL/OOB
    col_onehot = (lane == cc).astype(jnp.float32)

    (b_bl, b_br), (d_bl, d_br) = _component_codes(mode, immovable)
    codes = {b_bl, b_br, d_bl, d_br}

    # Gather rows on the MXU, then immediately reduce to the selected column so
    # everything downstream (min/max + component select) works on (g, 1).
    vals = {}
    if (0 in codes) or (2 in codes):
        rows1 = jnp.dot(row_onehot, dr1_ref[...],
                        preferred_element_type=jnp.float32)
        vals[0] = jnp.sum(rows1 * col_onehot, axis=-1, keepdims=True)
    if (1 in codes) or (2 in codes):
        rows2 = jnp.dot(row_onehot, dr2_ref[...],
                        preferred_element_type=jnp.float32)
        vals[1] = jnp.sum(rows2 * col_onehot, axis=-1, keepdims=True)
    if 2 in codes:
        vals[2] = (jnp.minimum(vals[0], vals[1]) if mode == 'minimum'
                   else jnp.maximum(vals[0], vals[1]))

    # Per-index component code (static config x dynamic quadrant/birth-death).
    if (b_bl, b_br) == (d_bl, d_br):          # DX_2 == DX: no birth/death split
        comp = jnp.where(offdiag, b_bl, b_br)
    else:
        is_birth = (lax.broadcasted_iota(jnp.int32, (g, 1), 0) % 2) == 0
        bl_code = b_bl if b_bl == d_bl else jnp.where(is_birth, b_bl, d_bl)
        br_code = b_br if b_br == d_br else jnp.where(is_birth, b_br, d_br)
        comp = jnp.where(offdiag, bl_code, br_code)

    present = sorted(codes)
    pick = vals[present[0]]
    for code in present[1:]:
        pick = jnp.where(comp == code, vals[code], pick)

    # TL / out-of-range indices already yield 0 via the zero one-hot rows.
    dgm_ref[...] = pick                       # (g, 1), interleaved birth/death


def _rtd_dgms_onehot(Dr1, Dr2, idx, *, mode, immovable):
    n = Dr1.shape[0]
    dim, g, _ = idx.shape
    card = g // 2
    kernel = functools.partial(_rtd_onehot_kernel, mode=mode,
                               immovable=immovable, n=n, card=card)
    # Footprint: Dr1 + Dr2 single-buffered + a handful of (g, n) intermediates
    # + slack; clamp to v7x's 64 MiB physical VMEM.
    vmem_limit = 2 * n * n * 4 + 8 * g * max(n, 128) * 4 + (8 << 20)
    vmem_limit = int(max(min(vmem_limit, 64 << 20), 16 << 20))
    return pl.pallas_call(
        kernel,
        out_shape=jax.ShapeDtypeStruct((dim, g, 1), jnp.float32),
        grid=(dim,),
        in_specs=[
            # Constant block index across the grid -> revisited block; a single
            # buffer halves resident VMEM with zero pipelining loss.
            pl.BlockSpec((n, n), lambda d: (0, 0),
                         pipeline_mode=pl.Buffered(1)),
            pl.BlockSpec((n, n), lambda d: (0, 0),
                         pipeline_mode=pl.Buffered(1)),
            pl.BlockSpec((None, g, 2), lambda d: (d, 0, 0)),
        ],
        out_specs=pl.BlockSpec((None, g, 1), lambda d: (d, 0, 0)),
        compiler_params=pltpu.CompilerParams(
            dimension_semantics=("parallel",),
            vmem_limit_bytes=vmem_limit),
    )(Dr1, Dr2, idx)


# ----------------------------------------------------------------------------
# Path 2 (large n): data-dependent row gather, grid=(dim, 2*card).
# Only the needed rows of Dr1/Dr2 are DMA'd -> HBM traffic O(card*n), not n^2.
# ----------------------------------------------------------------------------
def _rtd_gather_kernel(idx_ref, dr1_row_ref, dr2_row_ref, dgm_ref, *, mode,
                       immovable, n, card):
    g = 2 * card
    d = pl.program_id(0)
    i = pl.program_id(1)

    @pl.when(i == 0)
    def _():
        dgm_ref[...] = jnp.zeros_like(dgm_ref)

    base = (d * g + i) * 2
    r = idx_ref[base]
    c = idx_ref[base + 1]
    in_tl, offdiag, rr, cc = _decompose(r, c, n)
    invalid = jnp.logical_or(in_tl, jnp.logical_or(rr >= n, cc >= n))

    # Column select on the two gathered (1, n) rows -> scalars.
    lane = lax.broadcasted_iota(jnp.int32, (1, n), 1)
    colmask = lane == cc
    zero = jnp.zeros((1, n), jnp.float32)
    val0 = jnp.sum(jnp.where(colmask, dr1_row_ref[...], zero))
    val1 = jnp.sum(jnp.where(colmask, dr2_row_ref[...], zero))
    val2 = (jnp.minimum(val0, val1) if mode == 'minimum'
            else jnp.maximum(val0, val1))

    (b_bl, b_br), (d_bl, d_br) = _component_codes(mode, immovable)
    is_birth = (i % 2) == 0
    bl_code = b_bl if b_bl == d_bl else jnp.where(is_birth, b_bl, d_bl)
    br_code = b_br if b_br == d_br else jnp.where(is_birth, b_br, d_br)
    comp = jnp.where(offdiag, bl_code, br_code)

    val = jnp.where(comp == 0, val0, jnp.where(comp == 1, val1, val2))
    val = jnp.where(invalid, 0.0, val)

    # Scatter the scalar into the resident (g, 1) output tile.
    sel = lax.broadcasted_iota(jnp.int32, (g, 1), 0) == i
    dgm_ref[...] = jnp.where(sel, val, dgm_ref[...])


def _rtd_dgms_gather(Dr1, Dr2, idx, *, mode, immovable):
    n = Dr1.shape[0]
    dim, g, _ = idx.shape
    card = g // 2
    idx_flat = idx.reshape(-1)                # 1-D -> compact SMEM layout

    def row_map(d, i, idx_ref):
        base = (d * g + i) * 2
        r = idx_ref[base]
        c = idx_ref[base + 1]
        rr = jnp.where(r < n, c - n, r - n)
        rr = jnp.minimum(jnp.maximum(rr, 0), n - 1)   # TL/OOB: clamp (masked)
        return rr, 0

    kernel = functools.partial(_rtd_gather_kernel, mode=mode,
                               immovable=immovable, n=n, card=card)
    grid_spec = pltpu.PrefetchScalarGridSpec(
        num_scalar_prefetch=1,
        grid=(dim, g),
        in_specs=[
            pl.BlockSpec((pl.Element(1), n), row_map),
            pl.BlockSpec((pl.Element(1), n), row_map),
        ],
        out_specs=pl.BlockSpec((None, g, 1), lambda d, i, idx_ref: (d, 0, 0)),
    )
    return pl.pallas_call(
        kernel,
        out_shape=jax.ShapeDtypeStruct((dim, g, 1), jnp.float32),
        grid_spec=grid_spec,
        compiler_params=pltpu.CompilerParams(
            dimension_semantics=("parallel", "arbitrary")),
    )(idx_flat, Dr1, Dr2)


# ----------------------------------------------------------------------------
# Public wrappers.
# ----------------------------------------------------------------------------
def rtd_dgms(Dr1, Dr2, idx, *, mode='minimum', immovable=None,
             gather_threshold=512):
    """All persistence diagrams in one fused pallas_call.

    idx: (dim, 2*card, 2) int32 in the original interleaved order: even rows
         are birth (row, col) pairs into the joined matrix, odd rows deaths.
    Returns (dim, 2*card, 1) float32 values in the same interleaved order.
    """
    if Dr1.shape[0] != Dr2.shape[0]:
        raise ValueError('Point clouds must have same size.')
    Dr1 = Dr1.astype(jnp.float32)
    Dr2 = Dr2.astype(jnp.float32)
    idx = idx.astype(jnp.int32)
    if Dr1.shape[0] <= gather_threshold:
        return _rtd_dgms_onehot(Dr1, Dr2, idx, mode=mode, immovable=immovable)
    return _rtd_dgms_gather(Dr1, Dr2, idx, mode=mode, immovable=immovable)


def rtd_differentiable_forward(Dr1, Dr2, all_ids, *, dim=1, card=50,
                               mode='minimum', immovable=None,
                               gather_threshold=512):
    """Mirrors RTD_differentiable.forward: returns a list of `dim` diagrams.

    `all_ids` plays the role of the Rips(...) output: a list (len == dim) of
    flat index lists of length 4*card.
    """
    if Dr1.shape[0] != Dr2.shape[0]:
        raise ValueError('Point clouds must have same size.')
    dim = len(all_ids)
    idx = jnp.stack([jnp.reshape(jnp.asarray(ids, jnp.int32), (2 * card, 2))
                     for ids in all_ids], axis=0)          # (dim, 2*card, 2)
    vals = rtd_dgms(Dr1, Dr2, idx, mode=mode, immovable=immovable,
                    gather_threshold=gather_threshold)      # (dim, 2*card, 1)
    # Interleaved (birth, death) values -> (card, 2) diagrams, in plain XLA.
    return [jnp.reshape(vals[d], (card, 2)) for d in range(dim)]


def _reference_dgms(Dr1, Dr2, all_ids, *, card, mode, immovable):
    """Plain-JAX reference mirroring the torch code (for verification)."""
    n = Dr1.shape[0]
    Dzz = jnp.zeros((n, n), jnp.float32)
    if mode == 'minimum':
        Dr12 = jnp.minimum(Dr1, Dr2)
        DX = jnp.concatenate([jnp.concatenate([Dzz, Dr1.T], 1),
                              jnp.concatenate([Dr1, Dr12], 1)], 0)
        if immovable == 2:
            DX_2 = jnp.concatenate([jnp.concatenate([Dzz, Dr1.T], 1),
                                    jnp.concatenate([Dr1, Dr1], 1)], 0)
        elif immovable == 1:
            DX_2 = jnp.concatenate([jnp.concatenate([Dzz, Dr1.T], 1),
                                    jnp.concatenate([Dr1, Dr2], 1)], 0)
        else:
            DX_2 = DX
    else:
        Dr12 = jnp.maximum(Dr1, Dr2)
        DX = jnp.concatenate([jnp.concatenate([Dzz, Dr12.T], 1),
                              jnp.concatenate([Dr12, Dr2], 1)], 0)
        if immovable == 2:
            DX_2 = jnp.concatenate([jnp.concatenate([Dzz, Dr1.T], 1),
                                    jnp.concatenate([Dr1, Dr2], 1)], 0)
        elif immovable == 1:
            DX_2 = jnp.concatenate([jnp.concatenate([Dzz, Dr2.T], 1),
                                    jnp.concatenate([Dr2, Dr2], 1)], 0)
        else:
            DX_2 = DX
    out = []
    for ids in all_ids:
        tmp_idx = jnp.reshape(jnp.asarray(ids, jnp.int32), (2 * card, 2))
        if mode == 'minimum':
            dgm = jnp.stack([DX[tmp_idx[0::2, 0], tmp_idx[0::2, 1]],
                             DX_2[tmp_idx[1::2, 0], tmp_idx[1::2, 1]]], axis=1)
        else:
            dgm = jnp.stack([DX_2[tmp_idx[0::2, 0], tmp_idx[0::2, 1]],
                             DX[tmp_idx[1::2, 0], tmp_idx[1::2, 1]]], axis=1)
        out.append(dgm)
    return out


if __name__ == "__main__":
    N, D = 16, 8          # point-cloud size and feature dim
    CARD = 50

    key = jax.random.PRNGKey(0)
    k1, k2, k3 = jax.random.split(key, 3)

    # Two point clouds -> pairwise Euclidean distance matrices (glue, plain JAX).
    p1 = jax.random.normal(k1, (N, D), jnp.float32)
    p2 = jax.random.normal(k2, (N, D), jnp.float32)

    def pdist(p):
        d2 = jnp.sum((p[:, None, :] - p[None, :, :]) ** 2, axis=-1)
        return jnp.sqrt(jnp.maximum(d2, 0.0))

    Dr1 = pdist(p1)
    Dr2 = pdist(p2)

    # TODO(synk): Rips / ripser_parallel persistent-homology pairing is a
    # host-side combinatorial algorithm with no Pallas equivalent; the index
    # lists it would produce are synthesized deterministically here.
    def make_ids(dim):
        out = []
        for d in range(1, dim + 1):
            kd = jax.random.fold_in(k3, d)
            out.append(jax.random.randint(kd, (4 * CARD,), 0, 2 * N,
                                          dtype=jnp.int32))
        return out

    configs = [
        (1, 'minimum', None),
        (2, 'minimum', 2),
        (1, 'maximum', None),
        (2, 'maximum', 1),
    ]
    for dim, mode, immovable in configs:
        all_ids = make_ids(dim)
        refs = _reference_dgms(Dr1, Dr2, all_ids, card=CARD, mode=mode,
                               immovable=immovable)
        # threshold 512 -> full-matrix one-hot path; 0 -> DMA row-gather path.
        for thresh in (512, 0):
            dgms = rtd_differentiable_forward(
                Dr1, Dr2, all_ids, dim=dim, card=CARD, mode=mode,
                immovable=immovable, gather_threshold=thresh)
            dgms = [jax.block_until_ready(dg) for dg in dgms]
            for got, ref in zip(dgms, refs):
                assert got.shape == (CARD, 2), got.shape
                assert jnp.allclose(got, ref, atol=1e-5, rtol=1e-5), \
                    (mode, immovable, thresh)

    print("KERNEL_OK")
</pallas_src>

<mosaic_0001>
module attributes {stable_mosaic.version = 11 : i64} {
  func.func @_rtd_onehot_kernel(%arg0: i32, %arg1: memref<16x16xf32, #tpu.memory_space<vmem>>, %arg2: memref<16x16xf32, #tpu.memory_space<vmem>>, %arg3: memref<1x100x2xi32, #tpu.memory_space<vmem>>, %arg4: memref<1x100x1xf32, #tpu.memory_space<vmem>>) attributes {dimension_semantics = [#tpu.dimension_semantics<parallel>], iteration_bounds = array<i64: 1>, scalar_prefetch = 0 : i64, scratch_operands = 0 : i64, tpu.core_type = #tpu.core_type<tc>, window_params = [{pipeline_mode = #tpu.pipeline_mode<synchronous>, transform_indices = @transform_0, window_bounds = array<i64: 16, 16>}, {pipeline_mode = #tpu.pipeline_mode<synchronous>, transform_indices = @transform_1, window_bounds = array<i64: 16, 16>}, {transform_indices = @transform_2, window_bounds = array<i64: 1, 100, 2>}, {transform_indices = @transform_3, window_bounds = array<i64: 1, 100, 1>}]} {
    %c0 = arith.constant 0 : index
    %c0_0 = arith.constant 0 : index
    %c0_1 = arith.constant 0 : index
    %0 = vector.load %arg3[%c0, %c0_0, %c0_1] : memref<1x100x2xi32, #tpu.memory_space<vmem>>, vector<1x100x2xi32>
    %1 = vector.shape_cast %0 : vector<1x100x2xi32> to vector<100x2xi32>
    %2 = vector.extract_strided_slice %1 {offsets = [0, 0], sizes = [100, 1], strides = [1, 1]} : vector<100x2xi32> to vector<100x1xi32>
    %3 = vector.extract_strided_slice %1 {offsets = [0, 1], sizes = [100, 1], strides = [1, 1]} : vector<100x2xi32> to vector<100x1xi32>
    %c16_i32 = arith.constant 16 : i32
    %4 = vector.broadcast %c16_i32 : i32 to vector<100x1xi32>
    %5 = arith.cmpi slt, %2, %4 : vector<100x1xi32>
    %c16_i32_2 = arith.constant 16 : i32
    %6 = vector.broadcast %c16_i32_2 : i32 to vector<100x1xi32>
    %7 = arith.cmpi slt, %3, %6 : vector<100x1xi32>
    %8 = arith.xori %5, %7 : vector<100x1xi1>
    %c16_i32_3 = arith.constant 16 : i32
    %9 = vector.broadcast %c16_i32_3 : i32 to vector<100x1xi32>
    %10 = arith.subi %3, %9 : vector<100x1xi32>
    %c16_i32_4 = arith.constant 16 : i32
    %11 = vector.broadcast %c16_i32_4 : i32 to vector<100x1xi32>
    %12 = arith.subi %2, %11 : vector<100x1xi32>
    %13 = arith.select %5, %10, %12 : vector<100x1xi1>, vector<100x1xi32>
    %c16_i32_5 = arith.constant 16 : i32
    %14 = vector.broadcast %c16_i32_5 : i32 to vector<100x1xi32>
    %15 = arith.subi %3, %14 : vector<100x1xi32>
    %16 = arith.select %7, %3, %15 : vector<100x1xi1>, vector<100x1xi32>
    %17 = arith.select %5, %2, %16 : vector<100x1xi1>, vector<100x1xi32>
    %18 = tpu.iota {dimensions = array<i32: 1>} : vector<100x16xi32>
    %19 = vector.broadcast %13 : vector<100x1xi32> to vector<100x16xi32>
    %20 = arith.cmpi eq, %18, %19 : vector<100x16xi32>
    %21 = arith.extui %20 : vector<100x16xi1> to vector<100x16xi32>
    %22 = arith.sitofp %21 : vector<100x16xi32> to vector<100x16xf32>
    %23 = vector.broadcast %17 : vector<100x1xi32> to vector<100x16xi32>
    %24 = arith.cmpi eq, %18, %23 : vector<100x16xi32>
    %25 = arith.extui %24 : vector<100x16xi1> to vector<100x16xi32>
    %26 = arith.sitofp %25 : vector<100x16xi32> to vector<100x16xf32>
    %c0_6 = arith.constant 0 : index
    %c0_7 = arith.constant 0 : index
    %27 = vector.load %arg1[%c0_6, %c0_7] : memref<16x16xf32, #tpu.memory_space<vmem>>, vector<16x16xf32>
    %cst = arith.constant dense<0.000000e+00> : vector<100x16xf32>
    %28 = tpu.matmul %22, %27, %cst {dimension_numbers = #tpu.dot_dimension_numbers<[1], [0], [0], [1], [0, 0, 1, 1], [], []>} : vector<100x16xf32>, vector<16x16xf32>, vector<100x16xf32> -> vector<100x16xf32>
    %29 = arith.mulf %28, %26 : vector<100x16xf32>
    %cst_8 = arith.constant dense<0.000000e+00> : vector<100xf32>
    %30 = vector.multi_reduction <add>, %29, %cst_8 [1] : vector<100x16xf32> to vector<100xf32>
    %31 = vector.shape_cast %30 : vector<100xf32> to vector<100x1xf32>
    %c0_9 = arith.constant 0 : index
    %c0_10 = arith.constant 0 : index
    %32 = vector.load %arg2[%c0_9, %c0_10] : memref<16x16xf32, #tpu.memory_space<vmem>>, vector<16x16xf32>
    %cst_11 = arith.constant dense<0.000000e+00> : vector<100x16xf32>
    %33 = tpu.matmul %22, %32, %cst_11 {dimension_numbers = #tpu.dot_dimension_numbers<[1], [0], [0], [1], [0, 0, 1, 1], [], []>} : vector<100x16xf32>, vector<16x16xf32>, vector<100x16xf32> -> vector<100x16xf32>
    %34 = arith.mulf %33, %26 : vector<100x16xf32>
    %cst_12 = arith.constant dense<0.000000e+00> : vector<100xf32>
    %35 = vector.multi_reduction <add>, %34, %cst_12 [1] : vector<100x16xf32> to vector<100xf32>
    %36 = vector.shape_cast %35 : vector<100xf32> to vector<100x1xf32>
    %37 = arith.minimumf %31, %36 : vector<100x1xf32>
    %c0_i32 = arith.constant 0 : i32
    %c2_i32 = arith.constant 2 : i32
    %38 = vector.broadcast %c0_i32 : i32 to vector<100x1xi32>
    %39 = vector.broadcast %c2_i32 : i32 to vector<100x1xi32>
    %40 = arith.select %8, %38, %39 : vector<100x1xi1>, vector<100x1xi32>
    %c2_i32_13 = arith.constant 2 : i32
    %41 = vector.broadcast %c2_i32_13 : i32 to vector<100x1xi32>
    %42 = arith.cmpi eq, %40, %41 : vector<100x1xi32>
    %43 = arith.select %42, %37, %31 : vector<100x1xi1>, vector<100x1xf32>
    %c0_14 = arith.constant 0 : index
    %c0_15 = arith.constant 0 : index
    %c0_16 = arith.constant 0 : index
    %44 = vector.load %arg4[%c0_14, %c0_15, %c0_16] : memref<1x100x1xf32, #tpu.memory_space<vmem>>, vector<1x100x1xf32>
    %45 = vector.shape_cast %44 : vector<1x100x1xf32> to vector<100x1xf32>
    %46 = vector.shape_cast %43 : vector<100x1xf32> to vector<1x100x1xf32>
    tpu.vector_store %arg4[%c0_14, %c0_15, %c0_16], %46 {strides = array<i32>} : memref<1x100x1xf32, #tpu.memory_space<vmem>>, vector<1x100x1xf32>,
    return
  }
  func.func @transform_0(%arg0: i32) -> (i32, i32) {
    %c0_i32 = arith.constant 0 : i32
    %c0_i32_0 = arith.constant 0 : i32
    %c0_i32_1 = arith.constant 0 : i32
    return %c0_i32, %c0_i32_0 : i32, i32
  }
  func.func @transform_1(%arg0: i32) -> (i32, i32) {
    %c0_i32 = arith.constant 0 : i32
    %c0_i32_0 = arith.constant 0 : i32
    %c0_i32_1 = arith.constant 0 : i32
    return %c0_i32, %c0_i32_0 : i32, i32
  }
  func.func @transform_2(%arg0: i32) -> (i32, i32, i32) {
    %c0_i32 = arith.constant 0 : i32
    %c0_i32_0 = arith.constant 0 : i32
    %c0_i32_1 = arith.constant 0 : i32
    return %arg0, %c0_i32, %c0_i32_0 : i32, i32, i32
  }
  func.func @transform_3(%arg0: i32) -> (i32, i32, i32) {
    %c0_i32 = arith.constant 0 : i32
    %c0_i32_0 = arith.constant 0 : i32
    %c0_i32_1 = arith.constant 0 : i32
    return %arg0, %c0_i32, %c0_i32_0 : i32, i32, i32
  }
}

</mosaic_0001>

<bundles_post_ra>
// kernel: tpu_custom_call.1
= control target key start
LH: loop header
LB: loop body
LE: loop exit
PB: predicated region body
PF: predicated region fallthrough
CT: control target
= control target key end

     0   :  { %v1042_v3 = vmov 0   ;;  %s1043_s20 = smov 127   ;;  %v1044_v27 = vmov 0.0|0.0   ;;  %vm1045_vm3 = vmmov 0   ;;  %v1046_v38 = vmov 0.0   ;;  %s1699_s2 = inlined_call_operand.vmem [shape: s32[1,100,2], index: 2, kind: input, shape index: {}]   ;;  %s1700_s0 = inlined_call_operand.vmem [shape: f32[16,16], index: 0, kind: input, shape index: {}]   ;;  %s1701_s1 = inlined_call_operand.vmem [shape: f32[16,16], index: 1, kind: input, shape index: {}]   ;;  %s1702_s3 = inlined_call_operand.vmem [shape: f32[1,100,1], index: 3, kind: output, shape index: {}]  }
   0x1   :  { %v1071_v0 = vld [vmem:[%s1699_s2] sm:$0xff]  ;;  %v1076_v1 = vld [vmem:[%s1699_s2 + $0x10] sm:$0xff]  ;;  %v1081_v2 = vld [vmem:[%s1699_s2 + $0x8] sm:$0xff]  ;;  %1040 = vset.pattern.permute.xlu1 %v1042_v3  ;;  %1041 = vset.pattern.permute.xlu0 %v1042_v3  ;;  %vm369_vm14 = vcmask 130048  }
   0x2   :  { %v1086_v4 = vadd.s32 4294967280, %v1071_v0  ;;  %v1089_v5 = vadd.s32 4294967280, %v1076_v1  ;;  %v1094_v6 = vld [vmem:[%s1699_s2 + $0x18] sm:$0xff]  ;;  %v1101_v7 = vadd.s32 4294967280, %v1081_v2  ;;  %v1109_v9 = vld [vmem:[%s1699_s2 + $0x20] sm:$0xff]  ;;  %v1114_v10 = vld [vmem:[%s1699_s2 + $0x28] sm:$0xff]  ;;  %1028 = vmatprep.subr.bf16.mxu0 %v1044_v27  ;;  %1031 = vmatprep.subr.bf16.mxu1 %v1044_v27 }
   0x3   :  { %v1104_v8 = vadd.s32 4294967280, %v1094_v6  ;;  %v1121_v11 = vadd.s32 4294967280, %v1109_v9  ;;  %v1124_v12 = vadd.s32 4294967280, %v1114_v10  ;;  %v1129_v13 = vld [vmem:[%s1699_s2 + $0x30] sm:$0xff]  ;;  %v1134_v14 = vld [vmem:[%s1699_s2 + $0x38] sm:$0xff]  ;;  %v1149_v17 = vld [vmem:[%s1699_s2 + $0x40] sm:$0xff]  ;;  %946 = vmatprep.mubr.msk.f32.mxu0 %vm1045_vm3, %v1046_v38  ;;  %989 = vmatprep.mubr.msk.f32.mxu1 %vm1045_vm3, %v1046_v38 }
   0x4   :  { %118 = vrot.lane.b32.xlu0 %v1086_v4, %s1043_s20  ;;  %122 = vrot.lane.b32.xlu1 %v1089_v5, %s1043_s20  ;;  %v1141_v15 = vadd.s32 4294967280, %v1129_v13  ;;  %v1144_v16 = vadd.s32 4294967280, %v1134_v14  ;;  %v1154_v18 = vld [vmem:[%s1699_s2 + $0x48] sm:$0xff]  ;;  %v1161_v19 = vadd.s32 4294967280, %v1149_v17  ;;  %v1169_v21 = vld [vmem:[%s1699_s2 + $0x50] sm:$0xff]  ;;  %vm27_vm0 = vcmp.lt.s32.totalorder %v1071_v0, 16 }
   0x5   :  { %v1164_v20 = vadd.s32 4294967280, %v1154_v18  ;;  %v1174_v22 = vld [vmem:[%s1699_s2 + $0x58] sm:$0xff]  ;;  %v1181_v23 = vadd.s32 4294967280, %v1169_v21  ;;  %v1189_v25 = vld [vmem:[%s1699_s2 + $0x60] sm:$0xf]  ;;  %v368_v29 = vld [vmem:[%s1700_s0 + $0x8] sm:$0xff]  ;;  %v157_v62 = vsel %vm27_vm0, %v1071_v0, %v1086_v4 }
   0x6   :  { %v1184_v24 = vadd.s32 4294967280, %v1174_v22  ;;  %v1196_v26 = vadd.s32 4294967280, %v1189_v25  ;;  %v367_v28 = vld [vmem:[%s1700_s0] sm:$0xff]  ;;  %v593_v32 = vld [vmem:[%s1701_s1 + $0x8] sm:$0xff]  ;;  %vm29_vm1 = vcmp.lt.s32.totalorder %v1076_v1, 16  ;;  %vm28_vm2 = vcmp.lt.s32.totalorder %v1081_v2, 16 }
   0x7   :  { %v592_v30 = vld [vmem:[%s1701_s1] sm:$0xff]  ;;  %v1029_v31 = vpack.c.bf16 %v368_v29, %v367_v28  ;;  %vm30_vm4 = vcmp.lt.s32.totalorder %v1094_v6, 16  ;;  %vm31_vm5 = vcmp.lt.s32.totalorder %v1109_v9, 16  ;;  %vm32_vm6 = vcmp.lt.s32.totalorder %v1114_v10, 16 }
   0x8   :  { %120 = vrot.lane.b32.xlu0 %v1101_v7, %s1043_s20  ;;  %124 = vrot.lane.b32.xlu1 %v1104_v8, %s1043_s20  ;;  %v1032_v35 = vpack.c.bf16 %v593_v32, %v592_v30  ;;  %vm33_vm7 = vcmp.lt.s32.totalorder %v1129_v13, 16  ;;  %vm34_vm8 = vcmp.lt.s32.totalorder %v1134_v14, 16  ;;  %vm35_vm9 = vcmp.lt.s32.totalorder %v1149_v17, 16 }
   0x9   :  { %1030 = vmatpush3.bf16.msra.mxu0 %v1029_v31  ;;  %vm1706_vm10 = vcmp.lt.s32.totalorder %v1154_v18, 16  ;;  %vm1705_vm11 = vcmp.lt.s32.totalorder %v1169_v21, 16  ;;  %vm1704_vm12 = vcmp.lt.s32.totalorder %v1174_v22, 16  ;;  %vm1703_vm13 = vcmp.lt.s32.totalorder %v1189_v25, 16 }
   0xa   :  { %1033 = vmatpush3.bf16.msra.mxu1 %v1032_v35  ;;  %v158_v61 = vsel %vm28_vm2, %v1081_v2, %v1101_v7  ;;  %v160_v63 = vsel %vm30_vm4, %v1094_v6, %v1104_v8  ;;  %v159_v27 = vsel %vm29_vm1, %v1076_v1, %v1089_v5  ;;  %v45_v28 = vsel %vm32_vm6, 1, %v1042_v3 }
   0xb   :  { %v44_v29 = vsel %vm31_vm5, 1, %v1042_v3  ;;  %v47_v30 = vsel %vm34_vm8, 1, %v1042_v3  ;;  %v46_v31 = vsel %vm33_vm7, 1, %v1042_v3  ;;  %v48_v32 = vsel %vm35_vm9, 1, %v1042_v3 }
   0xc   :  { %126 = vrot.lane.b32.xlu0 %v1121_v11, %s1043_s20  ;;  %128 = vrot.lane.b32.xlu1 %v1124_v12, %s1043_s20 }
  0x10   :  { %130 = vrot.lane.b32.xlu0 %v1141_v15, %s1043_s20  ;;  %132 = vrot.lane.b32.xlu1 %v1144_v16, %s1043_s20 }
  0x14   :  { %134 = vrot.lane.b32.xlu0 %v1161_v19, %s1043_s20  ;;  %136 = vrot.lane.b32.xlu1 %v1164_v20, %s1043_s20 }
  0x18   :  { %138 = vrot.lane.b32.xlu0 %v1181_v23, %s1043_s20  ;;  %140 = vrot.lane.b32.xlu1 %v1184_v24, %s1043_s20 }
  0x1c   :  { %142 = vrot.lane.b32.xlu0 %v1196_v26, %s1043_s20 }
  0x76   :  { %v119_v33 = vpop.permute.xlu0 %118  ;;  %v123_v34 = vpop.permute.xlu1 %122 }
  0x77   :  { %v144_v36 = vsel %vm27_vm0, %v119_v33, %v1086_v4  ;;  %v146_v37 = vsel %vm29_vm1, %v123_v34, %v1089_v5  ;;  %v162_v4 = vsel %vm32_vm6, %v1114_v10, %v1124_v12  ;;  %v164_v5 = vsel %vm34_vm8, %v1134_v14, %v1144_v16 }
  0x78   :  { %212 = vperm.xlu1 %1040, %v144_v36   ;;  %v209_v33 = vlaneseq }
  0x7a   :  { %v121_v39 = vpop.permute.xlu0 %120  ;;  %v125_v40 = vpop.permute.xlu1 %124  ;;  %v1369_v34 = vand.u32 127, %v209_v33 }
  0x7b   :  { %v145_v41 = vsel %vm28_vm2, %v121_v39, %v1101_v7  ;;  %v147_v42 = vsel %vm30_vm4, %v125_v40, %v1104_v8  ;;  %v161_v7 = vsel %vm31_vm5, %v1109_v9, %v1121_v11  ;;  %v163_v8 = vsel %vm33_vm7, %v1129_v13, %v1141_v15 }
  0x7c   :  { %215 = vperm.xlu0 %1041, %v145_v41   ;;  %218 = vperm.xlu1 %1040, %v146_v37  }
  0x7e   :  { %v127_v43 = vpop.permute.xlu0 %126  ;;  %v129_v44 = vpop.permute.xlu1 %128 }
  0x7f   :  { %v148_v45 = vsel %vm31_vm5, %v127_v43, %v1121_v11  ;;  %v149_v46 = vsel %vm32_vm6, %v129_v44, %v1124_v12  ;;  %v166_v11 = vsel %vm1706_vm10, %v1154_v18, %v1164_v20  ;;  %v165_v12 = vsel %vm35_vm9, %v1149_v17, %v1161_v19 }
  0x80   :  { %224 = vperm.xlu0 %1041, %v148_v45   ;;  %221 = vperm.xlu1 %1040, %v147_v42  }
  0x82   :  { %v131_v47 = vpop.permute.xlu0 %130  ;;  %v133_v48 = vpop.permute.xlu1 %132 }
  0x83   :  { %v150_v49 = vsel %vm33_vm7, %v131_v47, %v1141_v15  ;;  %v151_v50 = vsel %vm34_vm8, %v133_v48, %v1144_v16  ;;  %v168_v15 = vsel %vm1704_vm12, %v1174_v22, %v1184_v24  ;;  %v167_v16 = vsel %vm1705_vm11, %v1169_v21, %v1181_v23 }
  0x84   :  { %230 = vperm.xlu0 %1041, %v150_v49   ;;  %227 = vperm.xlu1 %1040, %v149_v46  }
  0x86   :  { %v135_v51 = vpop.permute.xlu0 %134  ;;  %v137_v52 = vpop.permute.xlu1 %136 }
  0x87   :  { %v152_v53 = vsel %vm35_vm9, %v135_v51, %v1161_v19  ;;  %v153_v54 = vsel %vm1706_vm10, %v137_v52, %v1164_v20  ;;  %v169_v19 = vsel %vm1703_vm13, %v1189_v25, %v1196_v26  ;;  %v41_v20 = vsel %vm28_vm2, 1, %v1042_v3 }
  0x88   :  { %236 = vperm.xlu0 %1041, %v152_v53   ;;  %233 = vperm.xlu1 %1040, %v151_v50  }
  0x8a   :  { %v139_v55 = vpop.permute.xlu0 %138  ;;  %v141_v56 = vpop.permute.xlu1 %140 }
  0x8b   :  { %v154_v57 = vsel %vm1705_vm11, %v139_v55, %v1181_v23  ;;  %v155_v58 = vsel %vm1704_vm12, %v141_v56, %v1184_v24  ;;  %v40_v23 = vsel %vm27_vm0, 1, %v1042_v3  ;;  %v43_v24 = vsel %vm30_vm4, 1, %v1042_v3 }
  0x8c   :  { %242 = vperm.xlu0 %1041, %v154_v57   ;;  %239 = vperm.xlu1 %1040, %v153_v54  }
  0x8e   :  { %v143_v59 = vpop.permute.xlu0 %142 }
  0x8f   :  { %v156_v60 = vsel %vm1703_vm13, %v143_v59, %v1196_v26  ;;  %v42_v26 = vsel %vm29_vm1, 1, %v1042_v3 }
  0x90   :  { %248 = vperm.xlu0 %1041, %v156_v60   ;;  %245 = vperm.xlu1 %1040, %v155_v58  }
  0x94   :  { %172 = vrot.lane.b32.xlu0 %v158_v61, %s1043_s20  ;;  %170 = vrot.lane.b32.xlu1 %v157_v62, %s1043_s20 }
  0x98   :  { %176 = vrot.lane.b32.xlu0 %v160_v63, %s1043_s20  ;;  %174 = vrot.lane.b32.xlu1 %v159_v27, %s1043_s20 }
  0x9c   :  { %180 = vrot.lane.b32.xlu0 %v162_v4, %s1043_s20  ;;  %178 = vrot.lane.b32.xlu1 %v161_v7, %s1043_s20 }
  0xa0   :  { %184 = vrot.lane.b32.xlu0 %v164_v5, %s1043_s20  ;;  %182 = vrot.lane.b32.xlu1 %v163_v8, %s1043_s20 }
  0xa4   :  { %188 = vrot.lane.b32.xlu0 %v166_v11, %s1043_s20  ;;  %186 = vrot.lane.b32.xlu1 %v165_v12, %s1043_s20 }
  0xa8   :  { %192 = vrot.lane.b32.xlu0 %v168_v15, %s1043_s20  ;;  %190 = vrot.lane.b32.xlu1 %v167_v16, %s1043_s20 }
  0xac   :  { %194 = vrot.lane.b32.xlu1 %v169_v19, %s1043_s20  ;;  %55 = vrot.lane.b32.xlu0 %v41_v20, %s1043_s20 }
  0xb0   :  { %53 = vrot.lane.b32.xlu1 %v40_v23, %s1043_s20  ;;  %59 = vrot.lane.b32.xlu0 %v43_v24, %s1043_s20 }
  0xb4   :  { %57 = vrot.lane.b32.xlu1 %v42_v26, %s1043_s20  ;;  %63 = vrot.lane.b32.xlu0 %v45_v28, %s1043_s20 }
  0xb8   :  { %61 = vrot.lane.b32.xlu1 %v44_v29, %s1043_s20  ;;  %67 = vrot.lane.b32.xlu0 %v47_v30, %s1043_s20 }
  0xbc   :  { %65 = vrot.lane.b32.xlu1 %v46_v31, %s1043_s20 }
  0xc0   :  { %69 = vrot.lane.b32.xlu1 %v48_v32, %s1043_s20 }
  0xf7   :  { %v213_v35 = vpop.permute.xlu1 %212 }
  0xf8   :  { %vm250_vm15 = vcmp.eq.s32.totalorder %v1369_v34, %v213_v35 }
  0xf9   :  { %v860_v36 = vsel %vm250_vm15, 1.0, %v1046_v38 }
  0xfa   :  { %947 = vmatmul.mubr.msk.f32.vlgmr.msra.gmra.mrb[0].mxu0 %vm369_vm14, %v860_v36  ;;  %990 = vmatmul.mubr.msk.f32.vlgmr.msra.gmra.mrb[0].mxu1 %vm369_vm14, %v860_v36 }
  0xfb   :  { %v216_v37 = vpop.permute.xlu0 %215  ;;  %v219_v39 = vpop.permute.xlu1 %218  ;;  %949 = vmatprep.mubr.msk.f32.mxu0 %vm1045_vm3, %v1046_v38  ;;  %992 = vmatprep.mubr.msk.f32.mxu1 %vm1045_vm3, %v1046_v38 }
  0xfc   :  { %vm251_vm13 = vcmp.eq.s32.totalorder %v1369_v34, %v216_v37  ;;  %vm252_vm12 = vcmp.eq.s32.totalorder %v1369_v34, %v219_v39 }
  0xfd   :  { %v861_v40 = vsel %vm251_vm13, 1.0, %v1046_v38  ;;  %v862_v43 = vsel %vm252_vm12, 1.0, %v1046_v38 }
  0xfe   :  { %950 = vmatmul.mubr.msk.f32.gmra.mrb[2].mxu0 %vm369_vm14, %v861_v40  ;;  %993 = vmatmul.mubr.msk.f32.gmra.mrb[2].mxu1 %vm369_vm14, %v861_v40  ;;  %v49_v40 = vsel %vm1706_vm10, 1, %v1042_v3 }
  0xff   :  { %v225_v41 = vpop.permute.xlu0 %224  ;;  %v222_v42 = vpop.permute.xlu1 %221  ;;  %952 = vmatprep.mubr.msk.f32.mxu0 %vm1045_vm3, %v1046_v38  ;;  %995 = vmatprep.mubr.msk.f32.mxu1 %vm1045_vm3, %v1046_v38 }
 0x100   :  { %vm253_vm15 = vcmp.eq.s32.totalorder %v1369_v34, %v222_v42  ;;  %vm254_vm13 = vcmp.eq.s32.totalorder %v1369_v34, %v225_v41 }
 0x101   :  { %v863_v46 = vsel %vm253_vm15, 1.0, %v1046_v38  ;;  %v864_v49 = vsel %vm254_vm13, 1.0, %v1046_v38 }
 0x102   :  { %953 = vmatmul.mubr.msk.f32.gmra.mrb[4].mxu0 %vm369_vm14, %v862_v43  ;;  %996 = vmatmul.mubr.msk.f32.gmra.mrb[4].mxu1 %vm369_vm14, %v862_v43 }
 0x103   :  { %v231_v44 = vpop.permute.xlu0 %230  ;;  %v228_v45 = vpop.permute.xlu1 %227  ;;  %955 = vmatprep.mubr.msk.f32.mxu0 %vm1045_vm3, %v1046_v38  ;;  %998 = vmatprep.mubr.msk.f32.mxu1 %vm1045_vm3, %v1046_v38 }
 0x104   :  { %vm255_vm12 = vcmp.eq.s32.totalorder %v1369_v34, %v228_v45  ;;  %vm256_vm15 = vcmp.eq.s32.totalorder %v1369_v34, %v231_v44 }
 0x105   :  { %v865_v52 = vsel %vm255_vm12, 1.0, %v1046_v38  ;;  %v866_v55 = vsel %vm256_vm15, 1.0, %v1046_v38 }
 0x106   :  { %956 = vmatmul.mubr.msk.f32.gmra.mrb[6].mxu0 %vm369_vm14, %v863_v46  ;;  %999 = vmatmul.mubr.msk.f32.gmra.mrb[6].mxu1 %vm369_vm14, %v863_v46 }
 0x107   :  { %v237_v47 = vpop.permute.xlu0 %236  ;;  %v234_v48 = vpop.permute.xlu1 %233  ;;  %958 = vmatprep.mubr.msk.f32.mxu0 %vm1045_vm3, %v1046_v38  ;;  %1001 = vmatprep.mubr.msk.f32.mxu1 %vm1045_vm3, %v1046_v38 }
 0x108   :  { %vm257_vm13 = vcmp.eq.s32.totalorder %v1369_v34, %v234_v48  ;;  %vm258_vm12 = vcmp.eq.s32.totalorder %v1369_v34, %v237_v47 }
 0x109   :  { %v867_v60 = vsel %vm257_vm13, 1.0, %v1046_v38  ;;  %v868_v4 = vsel %vm258_vm12, 1.0, %v1046_v38 }
 0x10a   :  { %959 = vmatmul.mubr.msk.f32.gmra.mrb[8].mxu0 %vm369_vm14, %v864_v49  ;;  %1002 = vmatmul.mubr.msk.f32.gmra.mrb[8].mxu1 %vm369_vm14, %v864_v49 }
 0x10b   :  { %v243_v50 = vpop.permute.xlu0 %242  ;;  %v240_v51 = vpop.permute.xlu1 %239  ;;  %961 = vmatprep.mubr.msk.f32.mxu0 %vm1045_vm3, %v1046_v38  ;;  %1004 = vmatprep.mubr.msk.f32.mxu1 %vm1045_vm3, %v1046_v38 }
 0x10c   :  { %vm259_vm15 = vcmp.eq.s32.totalorder %v1369_v34, %v240_v51  ;;  %vm260_vm13 = vcmp.eq.s32.totalorder %v1369_v34, %v243_v50 }
 0x10d   :  { %v869_v12 = vsel %vm259_vm15, 1.0, %v1046_v38  ;;  %v870_v23 = vsel %vm260_vm13, 1.0, %v1046_v38  ;;  %vm1707_vm13 = vcmp.lt.s32.totalorder %v1174_v22, 16 }
 0x10e   :  { %962 = vmatmul.mubr.msk.f32.gmra.mrb[10].mxu0 %vm369_vm14, %v865_v52  ;;  %1005 = vmatmul.mubr.msk.f32.gmra.mrb[10].mxu1 %vm369_vm14, %v865_v52 }
 0x10f   :  { %v1416_v53 = vpop.permute.xlu0 %248  ;;  %v246_v54 = vpop.permute.xlu1 %245  ;;  %964 = vmatprep.mubr.msk.f32.mxu0 %vm1045_vm3, %v1046_v38  ;;  %1007 = vmatprep.mubr.msk.f32.mxu1 %vm1045_vm3, %v1046_v38 }
 0x110   :  { %vm261_vm12 = vcmp.eq.s32.totalorder %v1369_v34, %v246_v54  ;;  %vm262_vm15 = vcmp.eq.s32.totalorder %v1369_v34, %v1416_v53 }
 0x111   :  { %v871_v30 = vsel %vm261_vm12, 1.0, %v1046_v38  ;;  %v872_v36 = vsel %vm262_vm15, 1.0, %v1046_v38 }
 0x112   :  { %965 = vmatmul.mubr.msk.f32.gmra.mrb[12].mxu0 %vm369_vm14, %v866_v55  ;;  %1008 = vmatmul.mubr.msk.f32.gmra.mrb[12].mxu1 %vm369_vm14, %v866_v55 }
 0x113   :  { %v173_v56 = vpop.permute.xlu0 %172  ;;  %v171_v57 = vpop.permute.xlu1 %170  ;;  %967 = vmatprep.mubr.msk.f32.mxu0 %vm1045_vm3, %v1046_v38  ;;  %1010 = vmatprep.mubr.msk.f32.mxu1 %vm1045_vm3, %v1046_v38 }
 0x114   :  { %v196_v58 = vsel %vm27_vm0, %v1071_v0, %v171_v57  ;;  %v197_v59 = vsel %vm28_vm2, %v1081_v2, %v173_v56 }
 0x115   :  { %290 = vperm.xlu0 %1041, %v196_v58   ;;  %293 = vperm.xlu1 %1040, %v197_v59  }
 0x116   :  { %968 = vmatmul.mubr.msk.f32.gmra.mrb[14].mxu0 %vm369_vm14, %v867_v60  ;;  %1011 = vmatmul.mubr.msk.f32.gmra.mrb[14].mxu1 %vm369_vm14, %v867_v60 }
 0x117   :  { %v177_v61 = vpop.permute.xlu0 %176  ;;  %v175_v62 = vpop.permute.xlu1 %174  ;;  %970 = vmatprep.mubr.msk.f32.mxu0 %vm1045_vm3, %v1046_v38  ;;  %1013 = vmatprep.mubr.msk.f32.mxu1 %vm1045_vm3, %v1046_v38 }
 0x118   :  { %v198_v63 = vsel %vm29_vm1, %v1076_v1, %v175_v62  ;;  %v199_v27 = vsel %vm30_vm4, %v1094_v6, %v177_v61 }
 0x119   :  { %296 = vperm.xlu0 %1041, %v198_v63   ;;  %299 = vperm.xlu1 %1040, %v199_v27  }
 0x11a   :  { %971 = vmatmul.mubr.msk.f32.gmra.mrb[16].mxu0 %vm369_vm14, %v868_v4  ;;  %1014 = vmatmul.mubr.msk.f32.gmra.mrb[16].mxu1 %vm369_vm14, %v868_v4 }
 0x11b   :  { %v181_v7 = vpop.permute.xlu0 %180  ;;  %v179_v5 = vpop.permute.xlu1 %178  ;;  %973 = vmatprep.mubr.msk.f32.mxu0 %vm1045_vm3, %v1046_v38  ;;  %1016 = vmatprep.mubr.msk.f32.mxu1 %vm1045_vm3, %v1046_v38 }
 0x11c   :  { %v200_v8 = vsel %vm31_vm5, %v1109_v9, %v179_v5  ;;  %v201_v11 = vsel %vm32_vm6, %v1114_v10, %v181_v7 }
 0x11d   :  { %302 = vperm.xlu0 %1041, %v200_v8   ;;  %305 = vperm.xlu1 %1040, %v201_v11  }
 0x11e   :  { %974 = vmatmul.mubr.msk.f32.gmra.mrb[18].mxu0 %vm369_vm14, %v869_v12  ;;  %1017 = vmatmul.mubr.msk.f32.gmra.mrb[18].mxu1 %vm369_vm14, %v869_v12 }
 0x11f   :  { %v185_v15 = vpop.permute.xlu0 %184  ;;  %v183_v16 = vpop.permute.xlu1 %182  ;;  %976 = vmatprep.mubr.msk.f32.mxu0 %vm1045_vm3, %v1046_v38  ;;  %1019 = vmatprep.mubr.msk.f32.mxu1 %vm1045_vm3, %v1046_v38 }
 0x120   :  { %v202_v19 = vsel %vm33_vm7, %v1129_v13, %v183_v16  ;;  %v203_v20 = vsel %vm34_vm8, %v1134_v14, %v185_v15 }
 0x121   :  { %308 = vperm.xlu0 %1041, %v202_v19   ;;  %311 = vperm.xlu1 %1040, %v203_v20  }
 0x122   :  { %977 = vmatmul.mubr.msk.f32.gmra.mrb[20].mxu0 %vm369_vm14, %v870_v23  ;;  %1020 = vmatmul.mubr.msk.f32.gmra.mrb[20].mxu1 %vm369_vm14, %v870_v23 }
 0x123   :  { %v189_v24 = vpop.permute.xlu0 %188  ;;  %v187_v26 = vpop.permute.xlu1 %186  ;;  %979 = vmatprep.mubr.msk.f32.mxu0 %vm1045_vm3, %v1046_v38  ;;  %1022 = vmatprep.mubr.msk.f32.mxu1 %vm1045_vm3, %v1046_v38 }
 0x124   :  { %v204_v28 = vsel %vm35_vm9, %v1149_v17, %v187_v26  ;;  %v205_v29 = vsel %vm1706_vm10, %v1154_v18, %v189_v24 }
 0x125   :  { %314 = vperm.xlu0 %1041, %v204_v28   ;;  %317 = vperm.xlu1 %1040, %v205_v29  }
 0x126   :  { %980 = vmatmul.mubr.msk.f32.gmra.mrb[22].mxu0 %vm369_vm14, %v871_v30  ;;  %1023 = vmatmul.mubr.msk.f32.gmra.mrb[22].mxu1 %vm369_vm14, %v871_v30 }
 0x127   :  { %v193_v31 = vpop.permute.xlu0 %192  ;;  %v191_v32 = vpop.permute.xlu1 %190  ;;  %982 = vmatprep.mubr.msk.f32.mxu0 %vm1045_vm3, %v1046_v38  ;;  %1025 = vmatprep.mubr.msk.f32.mxu1 %vm1045_vm3, %v1046_v38  ;;  %vm1708_vm3 = vcmp.lt.s32.totalorder %v1189_v25, 16 }
 0x128   :  { %v206_v33 = vsel %vm1705_vm11, %v1169_v21, %v191_v32  ;;  %v207_v35 = vsel %vm1707_vm13, %v1174_v22, %v193_v31 }
 0x129   :  { %320 = vperm.xlu0 %1041, %v206_v33   ;;  %323 = vperm.xlu1 %1040, %v207_v35  }
 0x12a   :  { %983 = vmatmul.mubr.msk.f32.gmra.mrb[24].mxu0 %vm369_vm14, %v872_v36  ;;  %1026 = vmatmul.mubr.msk.f32.gmra.mrb[24].mxu1 %vm369_vm14, %v872_v36 }
 0x12b   :  { %v195_v37 = vpop.permute.xlu1 %194  ;;  %v1519_v42 = vpop.permute.xlu0 %55 }
 0x12c   :  { %v208_v39 = vsel %vm1708_vm3, %v1189_v25, %v195_v37 }
 0x12d   :  { %326 = vperm.xlu0 %1041, %v208_v39   ;;  %71 = vrot.lane.b32.xlu1 %v49_v40, %s1043_s20 }
 0x12f   :  { %v1517_v41 = vpop.permute.xlu1 %53  ;;  %v1523_v44 = vpop.permute.xlu0 %59 }
 0x133   :  { %v1521_v43 = vpop.permute.xlu1 %57  ;;  %v1527_v46 = vpop.permute.xlu0 %63 }
 0x137   :  { %v1525_v45 = vpop.permute.xlu1 %61  ;;  %v1531_v48 = vpop.permute.xlu0 %67 }
 0x13b   :  { %v1529_v47 = vpop.permute.xlu1 %65 }
 0x13f   :  { %v1533_v49 = vpop.permute.xlu1 %69 }
 0x194   :  { %v291_v50 = vpop.permute.xlu0 %290  ;;  %v294_v51 = vpop.permute.xlu1 %293 }
 0x195   :  { %vm328_vm12 = vcmp.eq.s32.totalorder %v1369_v34, %v291_v50  ;;  %vm329_vm15 = vcmp.eq.s32.totalorder %v1369_v34, %v294_v51 }
 0x196   :  { %v873_v52 = vsel %vm328_vm12, 1.0, %v1046_v38  ;;  %v874_v61 = vsel %vm329_vm15, 1.0, %v1046_v38 }
 0x198   :  { %v297_v58 = vpop.permute.xlu0 %296  ;;  %v300_v5 = vpop.permute.xlu1 %299 }
 0x199   :  { %vm330_vm13 = vcmp.eq.s32.totalorder %v1369_v34, %v297_v58  ;;  %vm331_vm3 = vcmp.eq.s32.totalorder %v1369_v34, %v300_v5 }
 0x19a   :  { %v875_v15 = vsel %vm330_vm13, 1.0, %v1046_v38  ;;  %v876_v31 = vsel %vm331_vm3, 1.0, %v1046_v38 }
 0x19c   :  { %v303_v26 = vpop.permute.xlu0 %302  ;;  %v306_v39 = vpop.permute.xlu1 %305 }
 0x19d   :  { %vm332_vm12 = vcmp.eq.s32.totalorder %v1369_v34, %v303_v26  ;;  %vm333_vm15 = vcmp.eq.s32.totalorder %v1369_v34, %v306_v39 }
 0x1a0   :  { %v309_v58 = vpop.permute.xlu0 %308 }
 0x1a1   :  { %vm334_vm13 = vcmp.eq.s32.totalorder %v1369_v34, %v309_v58 }
 0x1cd   :  { %v475_v53 = vpop.f32.mrb[0].mxu0  ;;  %v660_v54 = vpop.f32.mrb[0].mxu1 }
 0x1ce   :  { %v539_v55 = vmul.f32 %v873_v52, %v475_v53  ;;  %v948_v56 = vpop.f32.mrb[1].mxu0  ;;  %v991_v57 = vpop.f32.mrb[1].mxu1  ;;  %v724_v59 = vmul.f32 %v873_v52, %v660_v54  ;;  %v877_v52 = vsel %vm332_vm12, 1.0, %v1046_v38 }
 0x1d0   :  { %v552_v60 = vsel %vm369_vm14, %v539_v55, 0.0  ;;  %v737_v11 = vsel %vm369_vm14, %v724_v59, 0.0 }
 0x1d1   :  { %v665_v62 = vpop.f32.mrb[2].mxu1  ;;  %553 = vadd.xlane.f32.xlu0 %v552_v60  ;;  %v480_v63 = vpop.f32.mrb[2].mxu0 }
 0x1d2   :  { %v540_v27 = vmul.f32 %v874_v61, %v480_v63  ;;  %v951_v4 = vpop.f32.mrb[3].mxu0  ;;  %v994_v7 = vpop.f32.mrb[3].mxu1  ;;  %v725_v8 = vmul.f32 %v874_v61, %v665_v62  ;;  %v878_v62 = vsel %vm333_vm15, 1.0, %v1046_v38 }
 0x1d4   :  { %v555_v12 = vsel %vm369_vm14, %v540_v27, 0.0  ;;  %v740_v29 = vsel %vm369_vm14, %v725_v8, 0.0  ;;  %v312_v8 = vpop.permute.xlu1 %311 }
 0x1d5   :  { %v670_v16 = vpop.f32.mrb[4].mxu1  ;;  %738 = vadd.xlane.f32.xlu0 %v737_v11  ;;  %556 = vadd.xlane.f32.xlu1 %v555_v12  ;;  %v485_v19 = vpop.f32.mrb[4].mxu0  ;;  %vm335_vm3 = vcmp.eq.s32.totalorder %v1369_v34, %v312_v8 }
 0x1d6   :  { %v541_v20 = vmul.f32 %v875_v15, %v485_v19  ;;  %v954_v23 = vpop.f32.mrb[5].mxu0  ;;  %v997_v24 = vpop.f32.mrb[5].mxu1  ;;  %v726_v28 = vmul.f32 %v875_v15, %v670_v16  ;;  %v879_v16 = vsel %vm334_vm13, 1.0, %v1046_v38 }
 0x1d8   :  { %v558_v30 = vsel %vm369_vm14, %v541_v20, 0.0  ;;  %v743_v51 = vsel %vm369_vm14, %v726_v28, 0.0  ;;  %v315_v28 = vpop.permute.xlu0 %314 }
 0x1d9   :  { %v675_v32 = vpop.f32.mrb[6].mxu1  ;;  %741 = vadd.xlane.f32.xlu1 %v740_v29  ;;  %559 = vadd.xlane.f32.xlu0 %v558_v30  ;;  %v490_v33 = vpop.f32.mrb[6].mxu0  ;;  %vm336_vm12 = vcmp.eq.s32.totalorder %v1369_v34, %v315_v28 }
 0x1da   :  { %v727_v35 = vmul.f32 %v876_v31, %v675_v32  ;;  %v957_v36 = vpop.f32.mrb[7].mxu0  ;;  %v1000_v37 = vpop.f32.mrb[7].mxu1  ;;  %v542_v40 = vmul.f32 %v876_v31, %v490_v33  ;;  %v880_v32 = vsel %vm335_vm3, 1.0, %v1046_v38 }
 0x1dc   :  { %v746_v50 = vsel %vm369_vm14, %v727_v35, 0.0  ;;  %v561_v60 = vsel %vm369_vm14, %v542_v40, 0.0  ;;  %v318_v40 = vpop.permute.xlu1 %317 }
 0x1dd   :  { %v680_v53 = vpop.f32.mrb[8].mxu1  ;;  %747 = vadd.xlane.f32.xlu1 %v746_v50  ;;  %744 = vadd.xlane.f32.xlu0 %v743_v51  ;;  %v495_v54 = vpop.f32.mrb[8].mxu0  ;;  %vm337_vm15 = vcmp.eq.s32.totalorder %v1369_v34, %v318_v40 }
 0x1de   :  { %v543_v55 = vmul.f32 %v877_v52, %v495_v54  ;;  %v960_v56 = vpop.f32.mrb[9].mxu0  ;;  %v1003_v57 = vpop.f32.mrb[9].mxu1  ;;  %v728_v59 = vmul.f32 %v877_v52, %v680_v53  ;;  %v881_v53 = vsel %vm336_vm12, 1.0, %v1046_v38 }
 0x1e0   :  { %v564_v61 = vsel %vm369_vm14, %v543_v55, 0.0  ;;  %v749_v12 = vsel %vm369_vm14, %v728_v59, 0.0  ;;  %v321_v59 = vpop.permute.xlu0 %320 }
 0x1e1   :  { %v685_v63 = vpop.f32.mrb[10].mxu1  ;;  %562 = vadd.xlane.f32.xlu0 %v561_v60  ;;  %565 = vadd.xlane.f32.xlu1 %v564_v61  ;;  %v500_v27 = vpop.f32.mrb[10].mxu0  ;;  %vm338_vm13 = vcmp.eq.s32.totalorder %v1369_v34, %v321_v59 }
 0x1e2   :  { %v729_v4 = vmul.f32 %v878_v62, %v685_v63  ;;  %v963_v7 = vpop.f32.mrb[11].mxu0  ;;  %v1006_v5 = vpop.f32.mrb[11].mxu1  ;;  %v544_v11 = vmul.f32 %v878_v62, %v500_v27  ;;  %v882_v63 = vsel %vm337_vm15, 1.0, %v1046_v38  ;;  %vm588_vm15 = vcmask 125952  }
 0x1e4   :  { %v752_v15 = vsel %vm369_vm14, %v729_v4, 0.0  ;;  %v567_v30 = vsel %vm369_vm14, %v544_v11, 0.0  ;;  %v324_v11 = vpop.permute.xlu1 %323 }
 0x1e5   :  { %v690_v19 = vpop.f32.mrb[12].mxu1  ;;  %750 = vadd.xlane.f32.xlu0 %v749_v12  ;;  %753 = vadd.xlane.f32.xlu1 %v752_v15  ;;  %v505_v20 = vpop.f32.mrb[12].mxu0  ;;  %vm339_vm3 = vcmp.eq.s32.totalorder %v1369_v34, %v324_v11 }
 0x1e6   :  { %v545_v23 = vmul.f32 %v879_v16, %v505_v20  ;;  %v966_v24 = vpop.f32.mrb[13].mxu0  ;;  %v1009_v26 = vpop.f32.mrb[13].mxu1  ;;  %v730_v29 = vmul.f32 %v879_v16, %v690_v19  ;;  %v883_v19 = vsel %vm338_vm13, 1.0, %v1046_v38  ;;  %vm1709_vm13 = vcmp.lt.s32.totalorder %v1174_v22, 16 }
 0x1e8   :  { %v570_v31 = vsel %vm369_vm14, %v545_v23, 0.0  ;;  %v755_v51 = vsel %vm369_vm14, %v730_v29, 0.0  ;;  %v327_v29 = vpop.permute.xlu0 %326 }
 0x1e9   :  { %v695_v33 = vpop.f32.mrb[14].mxu1  ;;  %568 = vadd.xlane.f32.xlu0 %v567_v30  ;;  %571 = vadd.xlane.f32.xlu1 %v570_v31  ;;  %v510_v35 = vpop.f32.mrb[14].mxu0  ;;  %vm340_vm12 = vcmp.eq.s32.totalorder %v1369_v34, %v327_v29 }
 0x1ea   :  { %v731_v36 = vmul.f32 %v880_v32, %v695_v33  ;;  %v969_v37 = vpop.f32.mrb[15].mxu0  ;;  %v1012_v39 = vpop.f32.mrb[15].mxu1  ;;  %v546_v50 = vmul.f32 %v880_v32, %v510_v35  ;;  %v884_v33 = vsel %vm339_vm3, 1.0, %v1046_v38  ;;  %vm1710_vm3 = vcmp.lt.s32.totalorder %v1189_v25, 16 }
 0x1ec   :  { %v758_v52 = vsel %vm369_vm14, %v731_v36, 0.0  ;;  %v573_v61 = vsel %vm369_vm14, %v546_v50, 0.0 }
 0x1ed   :  { %v700_v54 = vpop.f32.mrb[16].mxu1  ;;  %756 = vadd.xlane.f32.xlu0 %v755_v51  ;;  %759 = vadd.xlane.f32.xlu1 %v758_v52  ;;  %v515_v55 = vpop.f32.mrb[16].mxu0 }
 0x1ee   :  { %v547_v56 = vmul.f32 %v881_v53, %v515_v55  ;;  %v972_v57 = vpop.f32.mrb[17].mxu0  ;;  %v1015_v58 = vpop.f32.mrb[17].mxu1  ;;  %v732_v60 = vmul.f32 %v881_v53, %v700_v54  ;;  %v885_v53 = vsel %vm340_vm12, 1.0, %v1046_v38  ;;  %v51_v38 = vsel %vm1709_vm13, 1, %v1042_v3 }
 0x1f0   :  { %v576_v62 = vsel %vm369_vm14, %v547_v56, 0.0  ;;  %v761_v15 = vsel %vm369_vm14, %v732_v60, 0.0 }
 0x1f1   :  { %v705_v27 = vpop.f32.mrb[18].mxu1  ;;  %574 = vadd.xlane.f32.xlu0 %v573_v61  ;;  %577 = vadd.xlane.f32.xlu1 %v576_v62  ;;  %v520_v4 = vpop.f32.mrb[18].mxu0  ;;  %v52_v62 = vsel %vm1710_vm3, 1, %v1042_v3  ;;  %vm81_vm3 = vcmp.ne.s32.totalorder %v1521_v43, 0 }
 0x1f2   :  { %v733_v7 = vmul.f32 %v882_v63, %v705_v27  ;;  %v975_v5 = vpop.f32.mrb[19].mxu0  ;;  %v1018_v8 = vpop.f32.mrb[19].mxu1  ;;  %v548_v12 = vmul.f32 %v882_v63, %v520_v4  ;;  %v50_v63 = vsel %vm1705_vm11, 1, %v1042_v3  ;;  %vm828_vm11 = vcmask 7168  }
 0x1f3   :  { %v1600_v27 = vpop.permute.xlu1 %71 }
 0x1f4   :  { %v764_v16 = vsel %vm369_vm14, %v733_v7, 0.0  ;;  %v579_v31 = vsel %vm369_vm14, %v548_v12, 0.0  ;;  %v1047_v7 = vmov 2  }
 0x1f5   :  { %v710_v20 = vpop.f32.mrb[20].mxu1  ;;  %762 = vadd.xlane.f32.xlu0 %v761_v15  ;;  %765 = vadd.xlane.f32.xlu1 %v764_v16  ;;  %v525_v23 = vpop.f32.mrb[20].mxu0 }
 0x1f6   :  { %v549_v24 = vmul.f32 %v883_v19, %v525_v23  ;;  %v978_v26 = vpop.f32.mrb[21].mxu0  ;;  %v1021_v28 = vpop.f32.mrb[21].mxu1  ;;  %v734_v30 = vmul.f32 %v883_v19, %v710_v20 }
 0x1f8   :  { %v582_v32 = vsel %vm369_vm14, %v549_v24, 0.0  ;;  %v767_v51 = vsel %vm369_vm14, %v734_v30, 0.0 }
 0x1f9   :  { %v715_v35 = vpop.f32.mrb[22].mxu1  ;;  %580 = vadd.xlane.f32.xlu0 %v579_v31  ;;  %583 = vadd.xlane.f32.xlu1 %v582_v32  ;;  %v530_v36 = vpop.f32.mrb[22].mxu0 }
 0x1fa   :  { %v735_v37 = vmul.f32 %v884_v33, %v715_v35  ;;  %v981_v39 = vpop.f32.mrb[23].mxu0  ;;  %v1024_v40 = vpop.f32.mrb[23].mxu1  ;;  %v550_v50 = vmul.f32 %v884_v33, %v530_v36 }
 0x1fc   :  { %v770_v52 = vsel %vm369_vm14, %v735_v37, 0.0  ;;  %v585_v34 = vsel %vm369_vm14, %v550_v50, 0.0  ;;  %vm79_vm14 = vcmp.ne.s32.totalorder %v1517_v41, 0 }
 0x1fd   :  { %v720_v54 = vpop.f32.mrb[24].mxu1  ;;  %768 = vadd.xlane.f32.xlu0 %v767_v51  ;;  %771 = vadd.xlane.f32.xlu1 %v770_v52  ;;  %v535_v55 = vpop.f32.mrb[24].mxu0  ;;  %vm92_vm12 = vmxor %vm27_vm0, %vm79_vm14 }
 0x1fe   :  { %v551_v56 = vmul.f32 %v885_v53, %v535_v55  ;;  %v984_v57 = vpop.f32.mrb[25].mxu0  ;;  %v1027_v58 = vpop.f32.mrb[25].mxu1  ;;  %v736_v59 = vmul.f32 %v885_v53, %v720_v54  ;;  %v789_v5 = vsel %vm92_vm12, 0, %v1047_v7  ;;  %vm94_vm0 = vmxor %vm29_vm1, %vm81_vm3  ;;  %vm83_vm1 = vcmp.ne.s32.totalorder %v1525_v45, 0 }
 0x1ff   :  { %vm802_vm10 = vcmp.eq.s32.totalorder %v789_v5, 2  ;;  %v791_v43 = vsel %vm94_vm0, 0, %v1047_v7 }
 0x200   :  { %v589_v60 = vsel %vm588_vm15, %v551_v56, 0.0  ;;  %v773_v61 = vsel %vm588_vm15, %v736_v59, 0.0  ;;  %vm80_vm15 = vcmp.ne.s32.totalorder %v1519_v42, 0  ;;  %vm804_vm12 = vcmp.eq.s32.totalorder %v791_v43, 2 }
 0x201   :  { %586 = vadd.xlane.f32.xlu0 %v585_v34  ;;  %590 = vadd.xlane.f32.xlu1 %v589_v60  ;;  %vm93_vm13 = vmxor %vm28_vm2, %vm80_vm15  ;;  %vm82_vm2 = vcmp.ne.s32.totalorder %v1523_v44, 0 }
 0x202   :  { %v790_v0 = vsel %vm93_vm13, 0, %v1047_v7  ;;  %vm96_vm15 = vmxor %vm31_vm5, %vm83_vm1  ;;  %vm85_vm5 = vcmp.ne.s32.totalorder %v1529_v47, 0 }
 0x203   :  { %vm803_vm14 = vcmp.eq.s32.totalorder %v790_v0, 2  ;;  %v793_v45 = vsel %vm96_vm15, 0, %v1047_v7 }
 0x204   :  { %vm806_vm0 = vcmp.eq.s32.totalorder %v793_v45, 2 }
 0x205   :  { %774 = vadd.xlane.f32.xlu0 %v773_v61 }
 0x212   :  { %75 = vrot.lane.b32.xlu1 %v51_v38, %s1043_s20 }
 0x216   :  { %77 = vrot.lane.b32.xlu1 %v52_v62, %s1043_s20 }
 0x21b   :  { %73 = vrot.lane.b32.xlu0 %v50_v63, %s1043_s20 }
 0x25e   :  { %v554_v4 = vpop.xlane.xlu0 %553 }
 0x262   :  { %v739_v8 = vpop.xlane.xlu0 %738  ;;  %v557_v3 = vpop.xlane.xlu1 %556 }
 0x263   :  { %v776_v41 = vmin.f32 %v554_v4, %v739_v8 }
 0x265   :  { %v815_v11 = vsel %vm802_vm10, %v776_v41, %v554_v4  ;;  %vm95_vm10 = vmxor %vm30_vm4, %vm82_vm2  ;;  %vm84_vm4 = vcmp.ne.s32.totalorder %v1527_v46, 0 }
 0x266   :  { %829 = vst.msk [vmem:[%s1702_s3] sm:$0xff] %vm828_vm11, %v815_v11  ;;  %v742_v2 = vpop.xlane.xlu1 %741  ;;  %v560_v42 = vpop.xlane.xlu0 %559  ;;  %v792_v44 = vsel %vm95_vm10, 0, %v1047_v7  ;;  %vm97_vm3 = vmxor %vm32_vm6, %vm84_vm4  ;;  %vm86_vm6 = vcmp.ne.s32.totalorder %v1531_v48, 0  ;;  %vm1711_vm4 = vcmp.lt.s32.totalorder %v1154_v18, 16 }
 0x267   :  { %v777_v12 = vmin.f32 %v557_v3, %v742_v2  ;;  %vm805_vm13 = vcmp.eq.s32.totalorder %v792_v44, 2  ;;  %v794_v46 = vsel %vm97_vm3, 0, %v1047_v7  ;;  %vm98_vm2 = vmxor %vm33_vm7, %vm85_vm5  ;;  %vm87_vm7 = vcmp.ne.s32.totalorder %v1533_v49, 0 }
 0x268   :  { %v795_v47 = vsel %vm98_vm2, 0, %v1047_v7  ;;  %vm99_vm10 = vmxor %vm34_vm8, %vm86_vm6  ;;  %vm88_vm8 = vcmp.ne.s32.totalorder %v1600_v27, 0 }
 0x269   :  { %v816_v15 = vsel %vm803_vm14, %v777_v12, %v557_v3  ;;  %vm807_vm14 = vcmp.eq.s32.totalorder %v794_v46, 2  ;;  %vm808_vm1 = vcmp.eq.s32.totalorder %v795_v47, 2  ;;  %v796_v48 = vsel %vm99_vm10, 0, %v1047_v7 }
 0x26a   :  { %830 = vst.msk [vmem:[%s1702_s3 + $0x8] sm:$0xff] %vm828_vm11, %v816_v15  ;;  %v748_v1 = vpop.xlane.xlu1 %747  ;;  %v745_v16 = vpop.xlane.xlu0 %744  ;;  %vm809_vm15 = vcmp.eq.s32.totalorder %v796_v48, 2 }
 0x26b   :  { %v778_v19 = vmin.f32 %v560_v42, %v745_v16 }
 0x26d   :  { %v817_v20 = vsel %vm804_vm12, %v778_v19, %v560_v42  ;;  %vm100_vm12 = vmxor %vm35_vm9, %vm87_vm7  ;;  %vm1713_vm7 = vcmp.lt.s32.totalorder %v1169_v21, 16 }
 0x26e   :  { %831 = vst.msk [vmem:[%s1702_s3 + $0x10] sm:$0xff] %vm828_vm11, %v817_v20  ;;  %v563_v6 = vpop.xlane.xlu0 %562  ;;  %v566_v23 = vpop.xlane.xlu1 %565  ;;  %v797_v49 = vsel %vm100_vm12, 0, %v1047_v7  ;;  %vm1714_vm12 = vcmp.lt.s32.totalorder %v1189_v25, 16 }
 0x26f   :  { %v779_v24 = vmin.f32 %v563_v6, %v748_v1  ;;  %vm810_vm9 = vcmp.eq.s32.totalorder %v797_v49, 2 }
 0x271   :  { %v818_v26 = vsel %vm805_vm13, %v779_v24, %v563_v6  ;;  %vm101_vm13 = vmxor %vm1711_vm4, %vm88_vm8  ;;  %vm841_vm4 = vcmask 3072  }
 0x272   :  { %832 = vst.msk [vmem:[%s1702_s3 + $0x18] sm:$0xff] %vm828_vm11, %v818_v26  ;;  %v751_v9 = vpop.xlane.xlu0 %750  ;;  %v754_v28 = vpop.xlane.xlu1 %753  ;;  %v798_v53 = vsel %vm101_vm13, 0, %v1047_v7 }
 0x273   :  { %v780_v29 = vmin.f32 %v566_v23, %v751_v9  ;;  %vm811_vm3 = vcmp.eq.s32.totalorder %v798_v53, 2 }
 0x275   :  { %v819_v30 = vsel %vm806_vm0, %v780_v29, %v566_v23  ;;  %vm1712_vm0 = vcmp.lt.s32.totalorder %v1174_v22, 16 }
 0x276   :  { %833 = vst.msk [vmem:[%s1702_s3 + $0x20] sm:$0xff] %vm828_vm11, %v819_v30  ;;  %v569_v10 = vpop.xlane.xlu0 %568  ;;  %v572_v31 = vpop.xlane.xlu1 %571 }
 0x277   :  { %v781_v32 = vmin.f32 %v569_v10, %v754_v28 }
 0x279   :  { %v820_v33 = vsel %vm807_vm14, %v781_v32, %v569_v10 }
 0x27a   :  { %834 = vst.msk [vmem:[%s1702_s3 + $0x28] sm:$0xff] %vm828_vm11, %v820_v33  ;;  %v757_v13 = vpop.xlane.xlu0 %756  ;;  %v760_v35 = vpop.xlane.xlu1 %759 }
 0x27b   :  { %v782_v36 = vmin.f32 %v572_v31, %v757_v13 }
 0x27d   :  { %v821_v37 = vsel %vm808_vm1, %v782_v36, %v572_v31 }
 0x27e   :  { %835 = vst.msk [vmem:[%s1702_s3 + $0x30] sm:$0xff] %vm828_vm11, %v821_v37  ;;  %v575_v14 = vpop.xlane.xlu0 %574  ;;  %v578_v39 = vpop.xlane.xlu1 %577 }
 0x27f   :  { %v783_v40 = vmin.f32 %v575_v14, %v760_v35 }
 0x281   :  { %v822_v50 = vsel %vm809_vm15, %v783_v40, %v575_v14 }
 0x282   :  { %836 = vst.msk [vmem:[%s1702_s3 + $0x38] sm:$0xff] %vm828_vm11, %v822_v50  ;;  %v763_v17 = vpop.xlane.xlu0 %762  ;;  %v766_v51 = vpop.xlane.xlu1 %765 }
 0x283   :  { %v784_v52 = vmin.f32 %v578_v39, %v763_v17 }
 0x285   :  { %v823_v54 = vsel %vm810_vm9, %v784_v52, %v578_v39 }
 0x286   :  { %837 = vst.msk [vmem:[%s1702_s3 + $0x40] sm:$0xff] %vm828_vm11, %v823_v54  ;;  %v581_v55 = vpop.xlane.xlu0 %580  ;;  %v584_v18 = vpop.xlane.xlu1 %583 }
 0x287   :  { %v785_v56 = vmin.f32 %v581_v55, %v766_v51 }
 0x289   :  { %v824_v57 = vsel %vm811_vm3, %v785_v56, %v581_v55 }
 0x28a   :  { %838 = vst.msk [vmem:[%s1702_s3 + $0x48] sm:$0xff] %vm828_vm11, %v824_v57  ;;  %v769_v58 = vpop.xlane.xlu0 %768  ;;  %v772_v59 = vpop.xlane.xlu1 %771 }
 0x28b   :  { %v786_v8 = vmin.f32 %v584_v18, %v769_v58 }
 0x28e   :  { %v587_v34 = vpop.xlane.xlu0 %586  ;;  %v591_v60 = vpop.xlane.xlu1 %590 }
 0x28f   :  { %v787_v62 = vmin.f32 %v587_v34, %v772_v59 }
 0x292   :  { %v775_v61 = vpop.xlane.xlu0 %774  ;;  %v76_v38 = vpop.permute.xlu1 %75 }
 0x293   :  { %vm90_vm5 = vcmp.ne.s32.totalorder %v76_v38, 0  ;;  %v788_v3 = vmin.f32 %v591_v60, %v775_v61 }
 0x294   :  { %vm103_vm2 = vmxor %vm1712_vm0, %vm90_vm5 }
 0x295   :  { %v800_v63 = vsel %vm103_vm2, 0, %v1047_v7 }
 0x296   :  { %vm813_vm6 = vcmp.eq.s32.totalorder %v800_v63, 2  ;;  %v74_v27 = vpop.permute.xlu0 %73  ;;  %v78_v4 = vpop.permute.xlu1 %77 }
 0x297   :  { %v826_v5 = vsel %vm813_vm6, %v787_v62, %v587_v34  ;;  %vm89_vm14 = vcmp.ne.s32.totalorder %v74_v27, 0  ;;  %vm91_vm10 = vcmp.ne.s32.totalorder %v78_v4, 0 }
 0x298   :  { %840 = vst.msk [vmem:[%s1702_s3 + $0x58] sm:$0xff] %vm828_vm11, %v826_v5  ;;  %vm102_vm1 = vmxor %vm1713_vm7, %vm89_vm14 }
 0x299   :  { %v799_v22 = vsel %vm102_vm1, 0, %v1047_v7  ;;  %vm104_vm8 = vmxor %vm1714_vm12, %vm91_vm10 }
 0x29a   :  { %vm812_vm15 = vcmp.eq.s32.totalorder %v799_v22, 2  ;;  %v801_v41 = vsel %vm104_vm8, 0, %v1047_v7 }
 0x29b   :  { %v825_v0 = vsel %vm812_vm15, %v786_v8, %v584_v18  ;;  %vm814_vm13 = vcmp.eq.s32.totalorder %v801_v41, 2 }
 0x29c   :  { %839 = vst.msk [vmem:[%s1702_s3 + $0x50] sm:$0xff] %vm828_vm11, %v825_v0  ;;  %v827_v21 = vsel %vm814_vm13, %v788_v3, %v591_v60 }
 0x29d   :  { %842 = vst.msk [vmem:[%s1702_s3 + $0x60] sm:$0xf] %vm841_vm4, %v827_v21 }

</bundles_post_ra>
